<compile_context>
chip_gen: v7x
topology: tpu7x:2x2x1
jax: 0.10.0
libtpu: 0.0.40
codegen_flags: <defaults>
</compile_context>

<pallas_src>
import functools

import jax
import jax.numpy as jnp
import numpy as np
from jax import lax
from jax.experimental import pallas as pl
from jax.experimental.pallas import tpu as pltpu

_NUM_CORES = 2       # exploit v7x's 2 TensorCores; harmless (sequential) on v5e/v6e
_MAX_BLOCK_N = 2048  # samples per tile (multiple of 128); tiny C keeps VMEM use low


def _ece_stats_kernel(x_ref, labels_ref,
                      count_ref, acc_sum_ref, conf_sum_ref,
                      *, n_bins: int, n_total: int, block_n: int,
                      inputs_are_probs: bool):
    """Accumulate per-bin (count, acc_sum, conf_sum) for one (C, TN) tile.

    x_ref      : (C, TN)  class-major, sample-on-lane slab (logits or probs)
    labels_ref : (1, TN)  int32
    *_ref out  : (1, n_bins, 1) f32 per-core accumulators (output-resident)
    """
    t = pl.program_id(1)

    # ---- init per-core accumulators on the first inner step -----------------
    @pl.when(t == 0)
    def _init():
        count_ref[...] = jnp.zeros_like(count_ref)
        acc_sum_ref[...] = jnp.zeros_like(acc_sum_ref)
        conf_sum_ref[...] = jnp.zeros_like(conf_sum_ref)

    x = x_ref[...].astype(jnp.float32)                       # (C, TN)
    labels = labels_ref[...]                                  # (1, TN) int32
    C, TN = x.shape

    # ---- confidence --------------------------------------------------------
    row_max = jnp.max(x, axis=0, keepdims=True)               # (1, TN)
    if inputs_are_probs:
        conf = row_max                                        # max prob directly
    else:
        # max softmax prob = exp(max - max) / sum(exp(logit - max)) = 1 / denom
        denom = jnp.sum(jnp.exp(x - row_max), axis=0, keepdims=True)
        conf = pl.reciprocal(denom, approx=False)             # (1, TN)

    # ---- argmax over classes (first occurrence), exact compare --------------
    cls_idx = lax.broadcasted_iota(jnp.int32, (C, TN), 0)
    masked_idx = jnp.where(x == row_max, cls_idx, jnp.int32(C))
    preds = jnp.min(masked_idx, axis=0, keepdims=True)        # (1, TN)
    acc = (preds == labels).astype(jnp.float32)               # (1, TN)

    # ---- mask padded / duplicated rows (tail tile & clamped dummy tiles) ----
    tile_idx = pl.program_id(0) * pl.num_programs(1) + t
    lane = lax.broadcasted_iota(jnp.int32, (1, TN), 1)
    valid = (tile_idx * block_n + lane) < n_total              # (1, TN) bool
    conf = jnp.where(valid, conf, 0.0)                         # conf=0 -> falls in no bin
    acc = jnp.where(valid, acc, 0.0)

    # ---- single-pass binning: (n_bins, TN) one-hot, 3 lane reductions -------
    n_bins_f = jnp.float32(n_bins)
    b_idx = lax.broadcasted_iota(jnp.int32, (n_bins, 1), 0).astype(jnp.float32)
    lower = b_idx / n_bins_f
    upper = (b_idx + 1.0) / n_bins_f                           # last upper == 1.0 exactly
    in_bin = jnp.logical_and(conf > lower, conf <= upper).astype(jnp.float32)  # (n_bins, TN)

    count_ref[...] += jnp.sum(in_bin, axis=1, keepdims=True).reshape(1, n_bins, 1)
    acc_sum_ref[...] += jnp.sum(in_bin * acc, axis=1, keepdims=True).reshape(1, n_bins, 1)
    conf_sum_ref[...] += jnp.sum(in_bin * conf, axis=1, keepdims=True).reshape(1, n_bins, 1)


def _ece_bin_stats(x_t, labels2d, n_bins: int, inputs_are_probs: bool):
    """Run the Pallas kernel; returns per-bin (count, acc_sum, conf_sum)."""
    C, N = x_t.shape

    # Block last dim must be a multiple of 128 or equal to the full dim.
    block_n = N if N <= _MAX_BLOCK_N else _MAX_BLOCK_N
    num_tiles = pl.cdiv(N, block_n)
    num_cores = min(_NUM_CORES, num_tiles)      # no dummy core for small inputs
    tiles_per_core = pl.cdiv(num_tiles, num_cores)

    def data_map(c, t):
        # Clamp: out-of-range (dummy) tiles re-read the last real tile; the kernel
        # masks their rows via the global sample index, so they contribute nothing.
        return (0, jnp.minimum(c * tiles_per_core + t, num_tiles - 1))

    stat_shape = jax.ShapeDtypeStruct((num_cores, n_bins, 1), jnp.float32)
    stat_spec = pl.BlockSpec((1, n_bins, 1), lambda c, t: (c, 0, 0))

    kernel = functools.partial(
        _ece_stats_kernel, n_bins=n_bins, n_total=N, block_n=block_n,
        inputs_are_probs=inputs_are_probs)

    bytes_accessed = int(x_t.size * x_t.dtype.itemsize
                         + labels2d.size * labels2d.dtype.itemsize
                         + 3 * num_cores * n_bins * 4)
    cost = pl.CostEstimate(
        flops=int(6 * N * C + 8 * N * n_bins),
        transcendentals=0 if inputs_are_probs else int(N * C),
        bytes_accessed=bytes_accessed)

    counts, acc_sums, conf_sums = pl.pallas_call(
        kernel,
        out_shape=(stat_shape, stat_shape, stat_shape),
        grid=(num_cores, tiles_per_core),
        in_specs=[
            pl.BlockSpec((C, block_n), data_map),
            pl.BlockSpec((1, block_n), data_map),
        ],
        out_specs=(stat_spec, stat_spec, stat_spec),
        compiler_params=pltpu.CompilerParams(
            dimension_semantics=("parallel", "arbitrary")),
        cost_estimate=cost,
    )(x_t, labels2d)

    # Combine per-core partials (tiny O(n_bins) work in plain JAX).
    count = jnp.sum(counts, axis=0)[:, 0]                     # (n_bins,)
    acc_sum = jnp.sum(acc_sums, axis=0)[:, 0]
    conf_sum = jnp.sum(conf_sums, axis=0)[:, 0]
    return count, acc_sum, conf_sum


def ece_pallas(logits=None, labels=None, softmaxes=None, n_bins: int = 15):
    """Expected Calibration Error.

    logits    : (N, C) float array (pre-softmax), or
    softmaxes : (N, C) float array of probabilities (takes precedence if given)
    labels    : (N,) integer array
    """
    if softmaxes is not None:
        x = jnp.asarray(softmaxes)
        inputs_are_probs = True
    else:
        x = jnp.asarray(logits)
        inputs_are_probs = False
    N, C = x.shape

    # Lane-dense layout: classes on sublanes, samples on lanes. Keep caller dtype.
    x_t = jnp.transpose(x)                                    # (C, N)
    labels2d = jnp.asarray(labels).astype(jnp.int32).reshape(1, N)

    count, acc_sum, conf_sum = _ece_bin_stats(x_t, labels2d, n_bins, inputs_are_probs)

    prop = count / jnp.float32(N)
    safe = jnp.maximum(count, 1.0)
    ece = jnp.sum(jnp.where(count > 0.0,
                            jnp.abs(conf_sum / safe - acc_sum / safe) * prop,
                            0.0))
    return ece


def _ece_reference_numpy(probs_or_logits, labels, n_bins=15, are_probs=False):
    """Mirror of the PyTorch/numpy reference semantics."""
    x = np.asarray(probs_or_logits, dtype=np.float32)
    labels = np.asarray(labels)
    if are_probs:
        probs = x
    else:
        z = x - x.max(axis=1, keepdims=True)
        ez = np.exp(z)
        probs = ez / ez.sum(axis=1, keepdims=True)
    bin_boundaries = np.linspace(0, 1, n_bins + 1)
    bin_lowers, bin_uppers = bin_boundaries[:-1], bin_boundaries[1:]
    confidences = np.max(probs, axis=1)
    predictions = np.argmax(probs, axis=1)
    accuracies = predictions == labels
    ece = 0.0
    for lo, hi in zip(bin_lowers, bin_uppers):
        in_bin = np.logical_and(confidences > lo, confidences <= hi)
        prop = np.mean(in_bin)
        if prop > 0:
            acc_in = np.mean(accuracies[in_bin])
            conf_in = np.mean(confidences[in_bin])
            ece += np.abs(conf_in - acc_in) * prop
    return float(ece)


if __name__ == "__main__":
    key = jax.random.PRNGKey(0)
    k1, k2, k3, k4 = jax.random.split(key, 4)
    N_BINS = 15

    # --- small case, logits path (matches the module's typical use) ---
    N, C = 64, 8
    logits = jax.random.normal(k1, (N, C), dtype=jnp.float32) * 3.0
    labels = jax.random.randint(k2, (N,), 0, C, dtype=jnp.int32)
    ece = jax.block_until_ready(ece_pallas(logits=logits, labels=labels, n_bins=N_BINS))
    ref = _ece_reference_numpy(np.asarray(logits), np.asarray(labels), n_bins=N_BINS)
    assert abs(float(ece) - ref) < 1e-4, (float(ece), ref)

    # --- small case, softmaxes path (second signature of the module) ---
    probs = jax.nn.softmax(logits, axis=1)
    ece_p = jax.block_until_ready(ece_pallas(softmaxes=probs, labels=labels, n_bins=N_BINS))
    ref_p = _ece_reference_numpy(np.asarray(probs), np.asarray(labels),
                                 n_bins=N_BINS, are_probs=True)
    assert abs(float(ece_p) - ref_p) < 1e-4, (float(ece_p), ref_p)

    # --- larger, non-aligned case: exercises tiling, tail masking, 2-core split ---
    N2, C2 = 2500, 10
    logits2 = jax.random.normal(k3, (N2, C2), dtype=jnp.float32) * 2.0
    labels2 = jax.random.randint(k4, (N2,), 0, C2, dtype=jnp.int32)
    ece2 = jax.block_until_ready(ece_pallas(logits=logits2, labels=labels2, n_bins=N_BINS))
    ref2 = _ece_reference_numpy(np.asarray(logits2), np.asarray(labels2), n_bins=N_BINS)
    assert abs(float(ece2) - ref2) < 1e-3, (float(ece2), ref2)

    print("KERNEL_OK")
</pallas_src>

<mosaic_0001>
module attributes {stable_mosaic.version = 11 : i64} {
  func.func @_ece_stats_kernel(%arg0: i32, %arg1: i32, %arg2: memref<8x64xf32, #tpu.memory_space<vmem>>, %arg3: memref<1x64xi32, #tpu.memory_space<vmem>>, %arg4: memref<1x15x1xf32, #tpu.memory_space<vmem>>, %arg5: memref<1x15x1xf32, #tpu.memory_space<vmem>>, %arg6: memref<1x15x1xf32, #tpu.memory_space<vmem>>) attributes {dimension_semantics = [#tpu.dimension_semantics<parallel>, #tpu.dimension_semantics<arbitrary>], iteration_bounds = array<i64: 1, 1>, scalar_prefetch = 0 : i64, scratch_operands = 0 : i64, tpu.core_type = #tpu.core_type<tc>, window_params = [{transform_indices = @transform_0, window_bounds = array<i64: 8, 64>}, {transform_indices = @transform_1, window_bounds = array<i64: 1, 64>}, {transform_indices = @transform_2, window_bounds = array<i64: 1, 15, 1>}, {transform_indices = @transform_3, window_bounds = array<i64: 1, 15, 1>}, {transform_indices = @transform_4, window_bounds = array<i64: 1, 15, 1>}]} {
    %c0_i32 = arith.constant 0 : i32
    %0 = arith.cmpi eq, %arg1, %c0_i32 : i32
    %1 = arith.extui %0 : i1 to i32
    %c0_i32_0 = arith.constant 0 : i32
    %2 = arith.cmpi ne, %1, %c0_i32_0 : i32
    scf.if %2 {
      %cst_33 = arith.constant 0.000000e+00 : f32
      %74 = vector.broadcast %cst_33 : f32 to vector<1x15x1xf32>
      %c0_34 = arith.constant 0 : index
      %c0_35 = arith.constant 0 : index
      %c0_36 = arith.constant 0 : index
      %75 = vector.load %arg4[%c0_34, %c0_35, %c0_36] : memref<1x15x1xf32, #tpu.memory_space<vmem>>, vector<1x15x1xf32>
      tpu.vector_store %arg4[%c0_34, %c0_35, %c0_36], %74 {strides = array<i32>} : memref<1x15x1xf32, #tpu.memory_space<vmem>>, vector<1x15x1xf32>,
      %cst_37 = arith.constant 0.000000e+00 : f32
      %76 = vector.broadcast %cst_37 : f32 to vector<1x15x1xf32>
      %c0_38 = arith.constant 0 : index
      %c0_39 = arith.constant 0 : index
      %c0_40 = arith.constant 0 : index
      %77 = vector.load %arg5[%c0_38, %c0_39, %c0_40] : memref<1x15x1xf32, #tpu.memory_space<vmem>>, vector<1x15x1xf32>
      tpu.vector_store %arg5[%c0_38, %c0_39, %c0_40], %76 {strides = array<i32>} : memref<1x15x1xf32, #tpu.memory_space<vmem>>, vector<1x15x1xf32>,
      %cst_41 = arith.constant 0.000000e+00 : f32
      %78 = vector.broadcast %cst_41 : f32 to vector<1x15x1xf32>
      %c0_42 = arith.constant 0 : index
      %c0_43 = arith.constant 0 : index
      %c0_44 = arith.constant 0 : index
      %79 = vector.load %arg6[%c0_42, %c0_43, %c0_44] : memref<1x15x1xf32, #tpu.memory_space<vmem>>, vector<1x15x1xf32>
      tpu.vector_store %arg6[%c0_42, %c0_43, %c0_44], %78 {strides = array<i32>} : memref<1x15x1xf32, #tpu.memory_space<vmem>>, vector<1x15x1xf32>,
    } else {
    }
    %c0 = arith.constant 0 : index
    %c0_1 = arith.constant 0 : index
    %3 = vector.load %arg2[%c0, %c0_1] : memref<8x64xf32, #tpu.memory_space<vmem>>, vector<8x64xf32>
    %c0_2 = arith.constant 0 : index
    %c0_3 = arith.constant 0 : index
    %4 = vector.load %arg3[%c0_2, %c0_3] : memref<1x64xi32, #tpu.memory_space<vmem>>, vector<1x64xi32>
    %cst = arith.constant dense<0xFF800000> : vector<64xf32>
    %5 = vector.multi_reduction <maximumf>, %3, %cst [0] : vector<8x64xf32> to vector<64xf32>
    %6 = vector.shape_cast %5 : vector<64xf32> to vector<1x64xf32>
    %7 = vector.broadcast %6 : vector<1x64xf32> to vector<8x64xf32>
    %8 = arith.subf %3, %7 : vector<8x64xf32>
    %9 = math.exp %8 : vector<8x64xf32>
    %cst_4 = arith.constant dense<0.000000e+00> : vector<64xf32>
    %10 = vector.multi_reduction <add>, %9, %cst_4 [0] : vector<8x64xf32> to vector<64xf32>
    %11 = vector.shape_cast %10 : vector<64xf32> to vector<1x64xf32>
    %12 = tpu.reciprocal %11 : vector<1x64xf32> -> vector<1x64xf32>
    %13 = tpu.iota {dimensions = array<i32: 0>} : vector<8x64xi32>
    %14 = vector.broadcast %6 : vector<1x64xf32> to vector<8x64xf32>
    %15 = arith.cmpf oeq, %3, %14 : vector<8x64xf32>
    %c8_i32 = arith.constant 8 : i32
    %16 = vector.broadcast %c8_i32 : i32 to vector<8x64xi32>
    %17 = arith.select %15, %13, %16 : vector<8x64xi1>, vector<8x64xi32>
    %cst_5 = arith.constant dense<2147483647> : vector<64xi32>
    %18 = vector.multi_reduction <minsi>, %17, %cst_5 [0] : vector<8x64xi32> to vector<64xi32>
    %19 = vector.shape_cast %18 : vector<64xi32> to vector<1x64xi32>
    %20 = arith.cmpi eq, %19, %4 : vector<1x64xi32>
    %21 = arith.extui %20 : vector<1x64xi1> to vector<1x64xi32>
    %22 = arith.sitofp %21 : vector<1x64xi32> to vector<1x64xf32>
    %c1_i32 = arith.constant 1 : i32
    %23 = arith.muli %arg0, %c1_i32 : i32
    %24 = arith.addi %23, %arg1 : i32
    %25 = tpu.iota {dimensions = array<i32: 1>} : vector<1x64xi32>
    %c64_i32 = arith.constant 64 : i32
    %26 = arith.muli %24, %c64_i32 : i32
    %27 = vector.broadcast %26 : i32 to vector<1x64xi32>
    %28 = arith.addi %27, %25 : vector<1x64xi32>
    %c64_i32_6 = arith.constant 64 : i32
    %29 = vector.broadcast %c64_i32_6 : i32 to vector<1x64xi32>
    %30 = arith.cmpi slt, %28, %29 : vector<1x64xi32>
    %cst_7 = arith.constant 0.000000e+00 : f32
    %31 = vector.broadcast %cst_7 : f32 to vector<1x64xf32>
    %32 = arith.select %30, %12, %31 : vector<1x64xi1>, vector<1x64xf32>
    %cst_8 = arith.constant 0.000000e+00 : f32
    %33 = vector.broadcast %cst_8 : f32 to vector<1x64xf32>
    %34 = arith.select %30, %22, %33 : vector<1x64xi1>, vector<1x64xf32>
    %35 = tpu.iota {dimensions = array<i32: 0>} : vector<15x1xi32>
    %36 = arith.sitofp %35 : vector<15x1xi32> to vector<15x1xf32>
    %cst_9 = arith.constant 1.500000e+01 : f32
    %37 = vector.broadcast %cst_9 : f32 to vector<15x1xf32>
    %38 = arith.divf %36, %37 : vector<15x1xf32>
    %cst_10 = arith.constant 1.000000e+00 : f32
    %39 = vector.broadcast %cst_10 : f32 to vector<15x1xf32>
    %40 = arith.addf %36, %39 : vector<15x1xf32>
    %cst_11 = arith.constant 1.500000e+01 : f32
    %41 = vector.broadcast %cst_11 : f32 to vector<15x1xf32>
    %42 = arith.divf %40, %41 : vector<15x1xf32>
    %43 = vector.broadcast %32 : vector<1x64xf32> to vector<15x64xf32>
    %44 = vector.broadcast %38 : vector<15x1xf32> to vector<15x64xf32>
    %45 = arith.cmpf ogt, %43, %44 : vector<15x64xf32>
    %46 = vector.broadcast %32 : vector<1x64xf32> to vector<15x64xf32>
    %47 = vector.broadcast %42 : vector<15x1xf32> to vector<15x64xf32>
    %48 = arith.cmpf ole, %46, %47 : vector<15x64xf32>
    %49 = arith.andi %45, %48 : vector<15x64xi1>
    %50 = arith.extui %49 : vector<15x64xi1> to vector<15x64xi32>
    %51 = arith.sitofp %50 : vector<15x64xi32> to vector<15x64xf32>
    %c0_12 = arith.constant 0 : index
    %c0_13 = arith.constant 0 : index
    %c0_14 = arith.constant 0 : index
    %52 = vector.load %arg4[%c0_12, %c0_13, %c0_14] : memref<1x15x1xf32, #tpu.memory_space<vmem>>, vector<1x15x1xf32>
    %cst_15 = arith.constant dense<0.000000e+00> : vector<15xf32>
    %53 = vector.multi_reduction <add>, %51, %cst_15 [1] : vector<15x64xf32> to vector<15xf32>
    %54 = vector.shape_cast %53 : vector<15xf32> to vector<15x1xf32>
    %55 = vector.shape_cast %54 : vector<15x1xf32> to vector<1x15x1xf32>
    %56 = arith.addf %52, %55 : vector<1x15x1xf32>
    %c0_16 = arith.constant 0 : index
    %c0_17 = arith.constant 0 : index
    %c0_18 = arith.constant 0 : index
    %57 = vector.load %arg4[%c0_16, %c0_17, %c0_18] : memref<1x15x1xf32, #tpu.memory_space<vmem>>, vector<1x15x1xf32>
    tpu.vector_store %arg4[%c0_16, %c0_17, %c0_18], %56 {strides = array<i32>} : memref<1x15x1xf32, #tpu.memory_space<vmem>>, vector<1x15x1xf32>,
    %c0_19 = arith.constant 0 : index
    %c0_20 = arith.constant 0 : index
    %c0_21 = arith.constant 0 : index
    %58 = vector.load %arg5[%c0_19, %c0_20, %c0_21] : memref<1x15x1xf32, #tpu.memory_space<vmem>>, vector<1x15x1xf32>
    %59 = vector.broadcast %34 : vector<1x64xf32> to vector<15x64xf32>
    %60 = arith.mulf %51, %59 : vector<15x64xf32>
    %cst_22 = arith.constant dense<0.000000e+00> : vector<15xf32>
    %61 = vector.multi_reduction <add>, %60, %cst_22 [1] : vector<15x64xf32> to vector<15xf32>
    %62 = vector.shape_cast %61 : vector<15xf32> to vector<15x1xf32>
    %63 = vector.shape_cast %62 : vector<15x1xf32> to vector<1x15x1xf32>
    %64 = arith.addf %58, %63 : vector<1x15x1xf32>
    %c0_23 = arith.constant 0 : index
    %c0_24 = arith.constant 0 : index
    %c0_25 = arith.constant 0 : index
    %65 = vector.load %arg5[%c0_23, %c0_24, %c0_25] : memref<1x15x1xf32, #tpu.memory_space<vmem>>, vector<1x15x1xf32>
    tpu.vector_store %arg5[%c0_23, %c0_24, %c0_25], %64 {strides = array<i32>} : memref<1x15x1xf32, #tpu.memory_space<vmem>>, vector<1x15x1xf32>,
    %c0_26 = arith.constant 0 : index
    %c0_27 = arith.constant 0 : index
    %c0_28 = arith.constant 0 : index
    %66 = vector.load %arg6[%c0_26, %c0_27, %c0_28] : memref<1x15x1xf32, #tpu.memory_space<vmem>>, vector<1x15x1xf32>
    %67 = vector.broadcast %32 : vector<1x64xf32> to vector<15x64xf32>
    %68 = arith.mulf %51, %67 : vector<15x64xf32>
    %cst_29 = arith.constant dense<0.000000e+00> : vector<15xf32>
    %69 = vector.multi_reduction <add>, %68, %cst_29 [1] : vector<15x64xf32> to vector<15xf32>
    %70 = vector.shape_cast %69 : vector<15xf32> to vector<15x1xf32>
    %71 = vector.shape_cast %70 : vector<15x1xf32> to vector<1x15x1xf32>
    %72 = arith.addf %66, %71 : vector<1x15x1xf32>
    %c0_30 = arith.constant 0 : index
    %c0_31 = arith.constant 0 : index
    %c0_32 = arith.constant 0 : index
    %73 = vector.load %arg6[%c0_30, %c0_31, %c0_32] : memref<1x15x1xf32, #tpu.memory_space<vmem>>, vector<1x15x1xf32>
    tpu.vector_store %arg6[%c0_30, %c0_31, %c0_32], %72 {strides = array<i32>} : memref<1x15x1xf32, #tpu.memory_space<vmem>>, vector<1x15x1xf32>,
    return
  }
  func.func @transform_0(%arg0: i32, %arg1: i32) -> (i32, i32) {
    %c1_i32 = arith.constant 1 : i32
    %0 = arith.muli %arg0, %c1_i32 : i32
    %1 = arith.addi %0, %arg1 : i32
    %c0_i32 = arith.constant 0 : i32
    %2 = arith.minsi %1, %c0_i32 : i32
    %c0_i32_0 = arith.constant 0 : i32
    %c0_i32_1 = arith.constant 0 : i32
    return %c0_i32_0, %2 : i32, i32
  }
  func.func @transform_1(%arg0: i32, %arg1: i32) -> (i32, i32) {
    %c1_i32 = arith.constant 1 : i32
    %0 = arith.muli %arg0, %c1_i32 : i32
    %1 = arith.addi %0, %arg1 : i32
    %c0_i32 = arith.constant 0 : i32
    %2 = arith.minsi %1, %c0_i32 : i32
    %c0_i32_0 = arith.constant 0 : i32
    %c0_i32_1 = arith.constant 0 : i32
    return %c0_i32_0, %2 : i32, i32
  }
  func.func @transform_2(%arg0: i32, %arg1: i32) -> (i32, i32, i32) {
    %c0_i32 = arith.constant 0 : i32
    %c0_i32_0 = arith.constant 0 : i32
    %c0_i32_1 = arith.constant 0 : i32
    return %arg0, %c0_i32, %c0_i32_0 : i32, i32, i32
  }
  func.func @transform_3(%arg0: i32, %arg1: i32) -> (i32, i32, i32) {
    %c0_i32 = arith.constant 0 : i32
    %c0_i32_0 = arith.constant 0 : i32
    %c0_i32_1 = arith.constant 0 : i32
    return %arg0, %c0_i32, %c0_i32_0 : i32, i32, i32
  }
  func.func @transform_4(%arg0: i32, %arg1: i32) -> (i32, i32, i32) {
    %c0_i32 = arith.constant 0 : i32
    %c0_i32_0 = arith.constant 0 : i32
    %c0_i32_1 = arith.constant 0 : i32
    return %arg0, %c0_i32, %c0_i32_0 : i32, i32, i32
  }
}

</mosaic_0001>

<bundles_post_ra>
// kernel: tpu_custom_call.1
= control target key start
LH: loop header
LB: loop body
LE: loop exit
PB: predicated region body
PF: predicated region fallthrough
CT: control target
= control target key end

     0   :  { %10 = vsyncpa [#allocation3], 0  ;;  %s235_s15 = smov [#allocation2]   ;;  %s358_s0 = inlined_call_operand.hbm [shape: f32[8,64], index: 0, kind: input, shape index: {}]   ;;  %s359_s1 = inlined_call_operand.vmem [shape: s32[1,64], index: 1, kind: input, shape index: {}]   ;;  %s360_s2 = inlined_call_operand.vmem [shape: f32[1,15,1], index: 2, kind: output, shape index: {0}]   ;;  %s361_s3 = inlined_call_operand.vmem [shape: f32[1,15,1], index: 3, kind: output, shape index: {1}]   ;;  %s362_s4 = inlined_call_operand.vmem [shape: f32[1,15,1], index: 4, kind: output, shape index: {2}]  }
   0x1   :  { %s22_s16 = sshll.u32 %s235_s15, 4  ;;  %s211_s19 = scalar_lea.hbm %s358_s0, 128  ;;  %s23_s16 = int_to_ptr.vmem [resolvable:$true] %s22_s16 }
   0x2   :  { %p212_p0 = scmp.ne.s32.totalorder %s358_s0, %s211_s19  ;;  %p215_p1 = scmp.lt.u32.totalorder %s211_s19, %s358_s0 }
   0x4   :  { %p217_p2 = pnand %p215_p1, %p212_p0 }
   0x6   :  { %220 = shalt.err (!%p217_p2)
}
   0x7   :  { %s221_s24 = scalar_lea.vmem %s23_s16, 128  ;;  %p226_p4 = scmp.lt.s32.totalorder %s23_s16, %s23_s16 }
   0x8   :  { %p222_p3 = scmp.ne.s32.totalorder %s23_s16, %s221_s24  ;;  %p227_p5 = scmp.lt.s32.totalorder %s221_s24, %s221_s24 }
   0xa   :  { %p228_p6 = por %p227_p5, %p226_p4 }
   0xc   :  { %p229_p7 = pnand %p228_p6, %p222_p3 }
   0xe   :  { %232 = shalt.err (!%p229_p7)
}
   0xf   :  { %25 = dma.hbm_to_vmem [thread:$0]  %s358_s0, 128, %s23_s16, [#allocation3]  }
  0x10   :  { %233 = dma.done.wait [#allocation3], 128  }
  0x11   :  { %234 = vsyncadd [#allocation3], 4294967168  ;;  %vm62_vm0 = vcmask 7168   ;;  %v236_v0 = vmov 0.0   ;;  %vm72_vm1 = vcmask 523264   ;;  %v70_v1 = vld [vmem:[#allocation2] sm:$0xff]  ;;  %v91_v6 = vlaneseq }
  0x12   :  { %66 = vst.msk [vmem:[%s361_s3] sm:$0xff] %vm62_vm0, %v236_v0  ;;  %63 = vst.msk [vmem:[%s360_s2] sm:$0xff] %vm62_vm0, %v236_v0  ;;  %v73_v2 = vsel %vm72_vm1, %v70_v1, -inf  ;;  %v71_v29 = vld [vmem:[%s359_s1] sm:$0x1]  ;;  %vm142_vm14 = vcmask 522240  }
  0x13   :  { %68 = vst.msk [vmem:[%s362_s4] sm:$0xff] %vm62_vm0, %v236_v0  ;;  %v74_v3 = vrot.slane %v73_v2, 4  ;;  %v92_v9 = vshrl.u32 %v91_v6, 7  ;;  %v110_v33 = vand.u32 127, %v91_v6  ;;  %vm64_vm15 = vcmask 6144  }
  0x14   :  { %67 = vst.msk [vmem:[%s361_s3 + $0x8] sm:$0x7f] %vm64_vm15, %v236_v0  ;;  %65 = vst.msk [vmem:[%s360_s2 + $0x8] sm:$0x7f] %vm64_vm15, %v236_v0 }
  0x15   :  { %v75_v4 = vmax.f32 %v73_v2, %v74_v3  ;;  %v117_v27 = vadd.s32 8, %v92_v9  ;;  %v118_v31 = vcvt.s32.f32 %v92_v9  ;;  %vm114_vm7 = vcmp.lt.s32.totalorder %v110_v33, 64  ;;  %69 = vst.msk [vmem:[%s362_s4 + $0x8] sm:$0x7f] %vm64_vm15, %v236_v0 }
  0x16   :  { %v156_v39 = vsub.s32 0, %v92_v9 }
  0x17   :  { %v76_v5 = vrot.slane %v75_v4, 2  ;;  %v119_v32 = vcvt.s32.f32 %v117_v27  ;;  %v123_v34 = vadd.f32 1.0, %v118_v31  ;;  %v121_v37 = vmul.f32 0.06666667, %v118_v31 }
  0x19   :  { %v77_v7 = vmax.f32 %v75_v4, %v76_v5  ;;  %v124_v35 = vadd.f32 1.0, %v119_v32  ;;  %v125_v38 = vmul.f32 0.06666667, %v123_v34  ;;  %v122_v41 = vmul.f32 0.06666667, %v119_v32  ;;  %v137_v58 = vld [vmem:[%s360_s2] sm:$0xff] }
  0x1a   :  { %v152_v59 = vld [vmem:[%s361_s3] sm:$0xff] }
  0x1b   :  { %v78_v8 = vrot.slane %v77_v7, 1  ;;  %v126_v42 = vmul.f32 0.06666667, %v124_v35  ;;  %v138_v63 = vld [vmem:[%s360_s2 + $0x8] sm:$0x7f]  ;;  %v170_v5 = vld [vmem:[%s362_s4] sm:$0xff] }
  0x1d   :  { %v79_v10 = vmax.f32 %v77_v7, %v78_v8  ;;  %v171_v7 = vld [vmem:[%s362_s4 + $0x8] sm:$0x7f] }
  0x1f   :  { %v80_v11 = vsub.f32 %v70_v1, %v79_v10  ;;  %vm93_vm2 = vcmp.eq.f32.partialorder %v70_v1, %v79_v10 }
  0x20   :  { %v94_v12 = vsel %vm93_vm2, %v92_v9, 8 }
  0x21   :  { %v81_v13 = vmul.f32 1.442695, %v80_v11  ;;  %v95_v14 = vsel %vm72_vm1, %v94_v12, 2147483647 }
  0x22   :  { %v96_v15 = vrot.slane %v95_v14, 4 }
  0x23   :  { %207 = vpow2.f32 %v81_v13 }
  0x24   :  { %vm97_vm3 = vcmp.lt.s32.totalorder %v95_v14, %v96_v15 }
  0x25   :  { %v98_v16 = vsel %vm97_vm3, %v95_v14, %v96_v15 }
  0x26   :  { %v99_v17 = vrot.slane %v98_v16, 2 }
  0x28   :  { %vm100_vm4 = vcmp.lt.s32.totalorder %v98_v16, %v99_v17 }
  0x29   :  { %v101_v21 = vsel %vm100_vm4, %v98_v16, %v99_v17 }
  0x2a   :  { %v102_v24 = vrot.slane %v101_v21, 1 }
  0x2c   :  { %vm103_vm5 = vcmp.lt.s32.totalorder %v101_v21, %v102_v24 }
  0x2d   :  { %v208_v18 = vpop.eup %207  ;;  %v104_v30 = vsel %vm103_vm5, %v101_v21, %v102_v24 }
  0x2e   :  { %v83_v19 = vsel %vm72_vm1, %v208_v18, 0.0  ;;  %vm105_vm6 = vcmp.eq.s32.totalorder %v104_v30, %v71_v29 }
  0x2f   :  { %v84_v20 = vrot.slane %v83_v19, 4  ;;  %v202_v36 = vsel %vm105_vm6, 1.0, %v236_v0 }
  0x30   :  { %v116_v40 = vsel %vm114_vm7, %v202_v36, 0.0 }
  0x31   :  { %v85_v22 = vadd.f32 %v84_v20, %v83_v19  ;;  %v157_v45 = vrot.slane %v116_v40, %v156_v39 }
  0x33   :  { %v86_v23 = vrot.slane %v85_v22, 2 }
  0x35   :  { %v87_v25 = vadd.f32 %v86_v23, %v85_v22 }
  0x37   :  { %v88_v26 = vrot.slane %v87_v25, 1 }
  0x39   :  { %v89_v28 = vadd.f32 %v88_v26, %v87_v25 }
  0x3b   :  { %209 = vrcp.f32 %v89_v28 }
  0x45   :  { %v210_v43 = vpop.eup %209 }
  0x46   :  { %v115_v44 = vsel %vm114_vm7, %v210_v43, 0.0 }
  0x47   :  { %vm127_vm8 = vcmp.gt.f32.partialorder %v115_v44, %v121_v37  ;;  %vm129_vm9 = vcmp.le.f32.partialorder %v115_v44, %v125_v38  ;;  %vm128_vm10 = vcmp.gt.f32.partialorder %v115_v44, %v122_v41  ;;  %vm130_vm11 = vcmp.le.f32.partialorder %v115_v44, %v126_v42 }
  0x48   :  { %vm131_vm12 = vmand %vm127_vm8, %vm129_vm9 }
  0x49   :  { %v203_v46 = vsel %vm131_vm12, 1.0, %v236_v0  ;;  %vm132_vm13 = vmand %vm128_vm10, %vm130_vm11 }
  0x4a   :  { %v158_v47 = vmul.f32 %v203_v46, %v157_v45  ;;  %v139_v48 = vsel %vm72_vm1, %v203_v46, 0.0  ;;  %v204_v49 = vsel %vm132_vm13, 1.0, %v236_v0  ;;  %v172_v53 = vmul.f32 %v203_v46, %v115_v44  ;;  %v153_v0 = vld [vmem:[%s361_s3 + $0x8] sm:$0x7f] }
  0x4b   :  { %140 = vadd.xlane.f32.xlu0 %v139_v48  ;;  %v159_v50 = vmul.f32 %v204_v49, %v157_v45  ;;  %v143_v52 = vsel %vm142_vm14, %v204_v49, 0.0  ;;  %v173_v55 = vmul.f32 %v204_v49, %v115_v44 }
  0x4c   :  { %v160_v51 = vsel %vm72_vm1, %v158_v47, 0.0  ;;  %v174_v56 = vsel %vm72_vm1, %v172_v53, 0.0 }
  0x4d   :  { %161 = vadd.xlane.f32.xlu1 %v160_v51  ;;  %v163_v54 = vsel %vm142_vm14, %v159_v50, 0.0  ;;  %v177_v57 = vsel %vm142_vm14, %v173_v55, 0.0 }
  0x4f   :  { %144 = vadd.xlane.f32.xlu0 %v143_v52 }
  0x51   :  { %164 = vadd.xlane.f32.xlu1 %v163_v54 }
  0x53   :  { %175 = vadd.xlane.f32.xlu0 %v174_v56 }
  0x55   :  { %178 = vadd.xlane.f32.xlu1 %v177_v57 }
  0xd8   :  { %v141_v60 = vpop.xlane.xlu0 %140 }
  0xd9   :  { %v146_v61 = vadd.f32 %v141_v60, %v137_v58 }
  0xda   :  { %v162_v62 = vpop.xlane.xlu1 %161 }
  0xdb   :  { %v166_v1 = vadd.f32 %v162_v62, %v152_v59  ;;  %149 = vst.msk [vmem:[%s360_s2] sm:$0xff] %vm62_vm0, %v146_v61 }
  0xdc   :  { %v145_v2 = vpop.xlane.xlu0 %144 }
  0xdd   :  { %168 = vst.msk [vmem:[%s361_s3] sm:$0xff] %vm62_vm0, %v166_v1  ;;  %v147_v3 = vadd.f32 %v145_v2, %v138_v63 }
  0xde   :  { %v165_v4 = vpop.xlane.xlu1 %164 }
  0xdf   :  { %v167_v6 = vadd.f32 %v165_v4, %v153_v0  ;;  %151 = vst.msk [vmem:[%s360_s2 + $0x8] sm:$0x7f] %vm64_vm15, %v147_v3 }
  0xe0   :  { %v176_v8 = vpop.xlane.xlu0 %175 }
  0xe1   :  { %169 = vst.msk [vmem:[%s361_s3 + $0x8] sm:$0x7f] %vm64_vm15, %v167_v6  ;;  %v180_v9 = vadd.f32 %v176_v8, %v170_v5 }
  0xe2   :  { %v179_v10 = vpop.xlane.xlu1 %178 }
  0xe3   :  { %v181_v11 = vadd.f32 %v179_v10, %v171_v7  ;;  %182 = vst.msk [vmem:[%s362_s4] sm:$0xff] %vm62_vm0, %v180_v9 }
  0xe5   :  { %183 = vst.msk [vmem:[%s362_s4 + $0x8] sm:$0x7f] %vm64_vm15, %v181_v11 }
  0xe6   :  { %196 = vsyncpa [#allocation3], 1 }

</bundles_post_ra>
